<compile_context>
chip_gen: v6e
topology: v6e:2x2x1
jax: 0.10.0
libtpu: 0.0.40
codegen_flags: <defaults>
</compile_context>

<pallas_src>
import functools

import jax
import jax.numpy as jnp
import numpy as np
from jax import lax
from jax.experimental import pallas as pl
from jax.experimental.pallas import tpu as pltpu

_LANE = 128
_SMALL_M_MAX = 512                      # single-row-tile ("small Gram") regime
_ROW_TILE_CANDIDATES = (512, 256, 128)  # MXU-friendly square output tiles
_K_TILE_CAP = 2048
_VMEM_LIMIT = 40 * 1024 * 1024          # fits v5e/v6e (128 MiB) and v7x (64 MiB physical)


def _round_up(x, m):
    return -(-x // m) * m


def _pad2d(x, rows, cols):
    r, c = x.shape
    if (r, c) == (rows, cols):
        return x
    return jnp.pad(x, ((0, rows - r), (0, cols - c)))


def _k_tiling(k):
    """Pad K to a lane multiple; largest 128-multiple tile (<= cap) dividing it."""
    k_pad = _round_up(k, _LANE)
    tk = _LANE
    t = _LANE
    while t <= min(_K_TILE_CAP, k_pad):
        if k_pad % t == 0:
            tk = t
        t += _LANE
    return k_pad, tk


def _row_tiling(m):
    """Square row/col tile for the blocked Gram: least zero padding, then biggest tile."""
    best_key, best = None, None
    for t in _ROW_TILE_CANDIDATES:
        pad = _round_up(m, t)
        key = (pad, -t)
        if best_key is None or key < best_key:
            best_key, best = key, (t, pad)
    return best


# ---------------------------------------------------------------------------
# Kernels
# ---------------------------------------------------------------------------

def _gram_small_kernel(f_ref, g_ref, acc_ref, *, scale):
    """Small-M regime: G = scale * F @ F.T with all rows resident in one tile.

    Single operand: the (M, tk) block is DMA'd once per K step (not twice).
    MXU operands are cast to bf16 in-kernel; accumulation is f32 in VMEM scratch.
    """
    k = pl.program_id(1)

    @pl.when(k == 0)
    def _():
        acc_ref[...] = jnp.zeros_like(acc_ref)

    blk = f_ref[...].astype(jnp.bfloat16)
    acc_ref[...] += lax.dot_general(
        blk, blk,
        dimension_numbers=(((1,), (1,)), ((), ())),
        preferred_element_type=jnp.float32)

    @pl.when(k == pl.num_programs(1) - 1)
    def _():
        g_ref[...] = acc_ref[...] * scale


def _gram_pairs_g_kernel(i_tbl, j_tbl, a_ref, bt_ref, g_ref, acc_ref, *, scale):
    """One block-upper-triangle tile (i, j) of G = scale * F @ F.T.

    RHS arrives pre-transposed (tk, tn): native MXU contraction, no per-step
    XLU transpose competing with the vmatmul pushes.
    """
    del i_tbl, j_tbl  # only consumed by the index_maps
    k = pl.program_id(1)

    @pl.when(k == 0)
    def _():
        acc_ref[...] = jnp.zeros_like(acc_ref)

    acc_ref[...] += jnp.dot(a_ref[...], bt_ref[...],
                            preferred_element_type=jnp.float32)

    @pl.when(k == pl.num_programs(1) - 1)
    def _():
        g_ref[...] = acc_ref[...] * scale


def _gram_pairs_mse_kernel(i_tbl, j_tbl, a_ref, bt_ref, t_ref, o_ref, acc_ref,
                           *, scale):
    """Fused Gram tile + sum((G - target)^2): only a per-tile scalar leaves VMEM."""
    del i_tbl, j_tbl
    k = pl.program_id(1)

    @pl.when(k == 0)
    def _():
        acc_ref[...] = jnp.zeros_like(acc_ref)

    acc_ref[...] += jnp.dot(a_ref[...], bt_ref[...],
                            preferred_element_type=jnp.float32)

    @pl.when(k == pl.num_programs(1) - 1)
    def _():
        d = acc_ref[...] * scale - t_ref[...]
        s = jnp.sum(d * d, axis=1, keepdims=True)   # (tm, 1) — XLU, once per tile
        s = jnp.sum(s, axis=0, keepdims=True)       # (1, 1)
        o_ref[...] = jnp.broadcast_to(s, o_ref.shape)


# ---------------------------------------------------------------------------
# Wrappers
# ---------------------------------------------------------------------------

def _gram_small(feats):
    """Full (M, M) f32 Gram for the small-row regime (M_pad <= _SMALL_M_MAX)."""
    m, k = feats.shape
    scale = 1.0 / float(m * k)
    m_pad = max(_round_up(m, 8), 8)
    k_pad, tk = _k_tiling(k)
    kt = k_pad // tk
    # Split the K reduction over a leading "parallel" axis so v7x's second
    # TensorCore has work when the (i, j) grid is a single tile.
    k_split = 2 if (kt % 2 == 0 and kt >= 2) else 1
    kt_per = kt // k_split

    f = _pad2d(feats, m_pad, k_pad)

    partials = pl.pallas_call(
        functools.partial(_gram_small_kernel, scale=scale),
        out_shape=jax.ShapeDtypeStruct((k_split, m_pad, m_pad), jnp.float32),
        grid_spec=pltpu.PrefetchScalarGridSpec(
            num_scalar_prefetch=0,
            grid=(k_split, kt_per),
            in_specs=[pl.BlockSpec((m_pad, tk),
                                   lambda s, kk: (0, s * kt_per + kk))],
            out_specs=pl.BlockSpec((None, m_pad, m_pad), lambda s, kk: (s, 0, 0)),
            scratch_shapes=[pltpu.VMEM((m_pad, m_pad), jnp.float32)],
        ),
        compiler_params=pltpu.CompilerParams(
            dimension_semantics=("parallel", "arbitrary"),
            vmem_limit_bytes=_VMEM_LIMIT),
        cost_estimate=pl.CostEstimate(
            flops=2 * m_pad * m_pad * k_pad,
            transcendentals=0,
            bytes_accessed=m_pad * k_pad * f.dtype.itemsize
            + k_split * m_pad * m_pad * 4),
    )(f)

    g = jnp.sum(partials, axis=0) if k_split > 1 else partials[0]
    return g[:m, :m]


def _gram_pairs(feats, target=None):
    """Blocked symmetric Gram over block-upper-triangle (i, j) tile pairs.

    target is None  -> full (M, M) f32 Gram (lower triangle mirrored in XLA).
    target is (M,M) -> mse(G, target) without materialising G in HBM.
    """
    m, k = feats.shape
    scale = 1.0 / float(m * k)
    t_row, m_pad = _row_tiling(m)
    k_pad, tk = _k_tiling(k)
    n_row_tiles = m_pad // t_row
    kt = k_pad // tk

    ii, jj = np.triu_indices(n_row_tiles)
    ii = ii.astype(np.int32)
    jj = jj.astype(np.int32)
    n_pairs = int(ii.size)
    i_tbl = jnp.asarray(ii)
    j_tbl = jnp.asarray(jj)

    # bf16 MXU operands, cast once in the wrapper (blocks are re-streamed
    # ~(T+1)/2 times -> halves HBM input traffic).  One-time transpose gives the
    # RHS its native (tk, tn) layout.
    f = _pad2d(feats, m_pad, k_pad).astype(jnp.bfloat16)
    ft = f.T

    a_spec = pl.BlockSpec((t_row, tk), lambda p, kk, it, jt: (it[p], kk))
    bt_spec = pl.BlockSpec((tk, t_row), lambda p, kk, it, jt: (kk, jt[p]))
    grid = (n_pairs, kt)
    compiler_params = pltpu.CompilerParams(
        dimension_semantics=("parallel", "arbitrary"),
        vmem_limit_bytes=_VMEM_LIMIT)
    matmul_flops = 2 * n_pairs * t_row * t_row * k_pad
    stream_bytes = n_pairs * 2 * t_row * k_pad * 2   # A + B^T blocks (bf16) per pair

    if target is None:
        raw = pl.pallas_call(
            functools.partial(_gram_pairs_g_kernel, scale=scale),
            out_shape=jax.ShapeDtypeStruct((m_pad, m_pad), jnp.float32),
            grid_spec=pltpu.PrefetchScalarGridSpec(
                num_scalar_prefetch=2,
                grid=grid,
                in_specs=[a_spec, bt_spec],
                out_specs=pl.BlockSpec(
                    (t_row, t_row), lambda p, kk, it, jt: (it[p], jt[p])),
                scratch_shapes=[pltpu.VMEM((t_row, t_row), jnp.float32)],
            ),
            compiler_params=compiler_params,
            cost_estimate=pl.CostEstimate(
                flops=matmul_flops,
                transcendentals=0,
                bytes_accessed=stream_bytes + n_pairs * t_row * t_row * 4),
        )(i_tbl, j_tbl, f, ft)
        # Only block-upper-triangle tiles were written; mirror across the diagonal.
        g = jnp.triu(raw) + jnp.triu(raw, 1).T
        return g[:m, :m]

    tgt = _pad2d(target.astype(jnp.float32), m_pad, m_pad)
    partial = pl.pallas_call(
        functools.partial(_gram_pairs_mse_kernel, scale=scale),
        out_shape=jax.ShapeDtypeStruct((n_pairs, 8, _LANE), jnp.float32),
        grid_spec=pltpu.PrefetchScalarGridSpec(
            num_scalar_prefetch=2,
            grid=grid,
            in_specs=[a_spec, bt_spec,
                      pl.BlockSpec((t_row, t_row),
                                   lambda p, kk, it, jt: (it[p], jt[p]))],
            out_specs=pl.BlockSpec((None, 8, _LANE),
                                   lambda p, kk, it, jt: (p, 0, 0)),
            scratch_shapes=[pltpu.VMEM((t_row, t_row), jnp.float32)],
        ),
        compiler_params=compiler_params,
        cost_estimate=pl.CostEstimate(
            flops=matmul_flops + 3 * n_pairs * t_row * t_row,
            transcendentals=0,
            bytes_accessed=stream_bytes
            + n_pairs * (t_row * t_row * 4 + 8 * _LANE * 4)),
    )(i_tbl, j_tbl, f, ft, tgt)

    tile_sums = partial[:, 0, 0]                                      # (n_pairs,)
    weights = jnp.asarray(np.where(ii == jj, 1.0, 2.0), jnp.float32)  # symmetry
    return jnp.sum(tile_sums * weights) / float(m * m)


# ---------------------------------------------------------------------------
# Public API mirroring the PyTorch module
# ---------------------------------------------------------------------------

@jax.jit
def gram_matrix(x):
    """Pallas equivalent of the PyTorch gram_matrix()."""
    b, h, w, f = x.shape
    feats = x.reshape(b * h, w * f)
    if _round_up(b * h, 8) <= _SMALL_M_MAX:
        return _gram_small(feats)
    return _gram_pairs(feats)


@jax.jit
def style_loss_forward(x, target_gram):
    """StyleLoss.forward: returns (input pass-through, mse(gram_matrix(x), target)).

    The nn.Module's `self.loss` buffer is returned explicitly (JAX is functional).
    """
    b, h, w, f = x.shape
    m = b * h
    feats = x.reshape(m, w * f)
    if _round_up(m, 8) <= _SMALL_M_MAX:
        g = _gram_small(feats)
        loss = jnp.mean(jnp.square(g - target_gram))   # tiny (M, M) map -> plain XLA
    else:
        loss = _gram_pairs(feats, target=target_gram)
    return x, loss


# ---------------------------------------------------------------------------
# Self-test
# ---------------------------------------------------------------------------

def _gram_ref(t):
    b, h, w, f = t.shape
    feats = t.reshape(b * h, w * f).astype(jnp.float32)
    g = jnp.dot(feats, feats.T, precision=lax.Precision.HIGHEST)
    return g / (b * h * w * f)


if __name__ == "__main__":
    key = jax.random.PRNGKey(0)
    cases = [
        ((2, 4, 16, 16),    "small Gram (M=8, K=256), single K block"),
        ((2, 64, 8, 512),   "small Gram (M=128, K=4096), K split on the parallel axis"),
        ((4, 256, 4, 1024), "blocked symmetric Gram (M=1024, K=4096), 2x2 row tiles"),
        ((3, 200, 5, 128),  "blocked symmetric Gram with row padding (M=600 -> 640)"),
    ]
    for shape, desc in cases:
        key, kx, kt_ = jax.random.split(key, 3)
        x = jax.random.normal(kx, shape, dtype=jnp.float32)
        target_feature = jax.random.normal(kt_, shape, dtype=jnp.float32)

        target_g = gram_matrix(target_feature)        # StyleLoss.__init__
        out, loss = style_loss_forward(x, target_g)   # StyleLoss.forward
        out, loss, target_g = jax.block_until_ready((out, loss, target_g))

        g_ref = _gram_ref(target_feature)
        loss_ref = jnp.mean((_gram_ref(x) - g_ref) ** 2)

        assert out.shape == x.shape and bool(jnp.all(out == x)), desc

        g_tol = 3e-2 * float(jnp.sqrt(jnp.mean(g_ref ** 2))) + 2e-6
        g_err = float(jnp.max(jnp.abs(target_g - g_ref)))
        assert g_err < g_tol, (desc, g_err, g_tol)

        l_err = abs(float(loss) - float(loss_ref))
        assert l_err <= 5e-2 * float(loss_ref) + 1e-12, (desc, float(loss), float(loss_ref))

    print("KERNEL_OK")
</pallas_src>

<mosaic_0001>
module attributes {stable_mosaic.version = 11 : i64} {
  func.func @_gram_small_kernel(%arg0: i32, %arg1: i32, %arg2: memref<8x256xf32, #tpu.memory_space<vmem>>, %arg3: memref<1x8x8xf32, #tpu.memory_space<vmem>>, %arg4: memref<8x8xf32, #tpu.memory_space<vmem>>) attributes {dimension_semantics = [#tpu.dimension_semantics<parallel>, #tpu.dimension_semantics<arbitrary>], iteration_bounds = array<i64: 1, 1>, scalar_prefetch = 0 : i64, scratch_operands = 1 : i64, tpu.core_type = #tpu.core_type<tc>, window_params = [{transform_indices = @transform_0, window_bounds = array<i64: 8, 256>}, {transform_indices = @transform_1, window_bounds = array<i64: 1, 8, 8>}]} {
    %c0_i32 = arith.constant 0 : i32
    %0 = arith.cmpi eq, %arg1, %c0_i32 : i32
    %1 = arith.extui %0 : i1 to i32
    %c0_i32_0 = arith.constant 0 : i32
    %2 = arith.cmpi ne, %1, %c0_i32_0 : i32
    scf.if %2 {
      %cst_8 = arith.constant 0.000000e+00 : f32
      %12 = vector.broadcast %cst_8 : f32 to vector<8x8xf32>
      %c0_9 = arith.constant 0 : index
      %c0_10 = arith.constant 0 : index
      %13 = vector.load %arg4[%c0_9, %c0_10] : memref<8x8xf32, #tpu.memory_space<vmem>>, vector<8x8xf32>
      tpu.vector_store %arg4[%c0_9, %c0_10], %12 {strides = array<i32>} : memref<8x8xf32, #tpu.memory_space<vmem>>, vector<8x8xf32>,
    } else {
    }
    %c0 = arith.constant 0 : index
    %c0_1 = arith.constant 0 : index
    %3 = vector.load %arg2[%c0, %c0_1] : memref<8x256xf32, #tpu.memory_space<vmem>>, vector<8x256xf32>
    %4 = arith.truncf %3 : vector<8x256xf32> to vector<8x256xbf16>
    %c0_2 = arith.constant 0 : index
    %c0_3 = arith.constant 0 : index
    %5 = vector.load %arg4[%c0_2, %c0_3] : memref<8x8xf32, #tpu.memory_space<vmem>>, vector<8x8xf32>
    %cst = arith.constant dense<0.000000e+00> : vector<8x8xf32>
    %6 = tpu.matmul %4, %4, %cst {dimension_numbers = #tpu.dot_dimension_numbers<[1], [1], [0], [0], [0, 0, 1, 0], [], []>} : vector<8x256xbf16>, vector<8x256xbf16>, vector<8x8xf32> -> vector<8x8xf32>
    %7 = arith.addf %5, %6 : vector<8x8xf32>
    %c0_4 = arith.constant 0 : index
    %c0_5 = arith.constant 0 : index
    %8 = vector.load %arg4[%c0_4, %c0_5] : memref<8x8xf32, #tpu.memory_space<vmem>>, vector<8x8xf32>
    tpu.vector_store %arg4[%c0_4, %c0_5], %7 {strides = array<i32>} : memref<8x8xf32, #tpu.memory_space<vmem>>, vector<8x8xf32>,
    %c0_i32_6 = arith.constant 0 : i32
    %9 = arith.cmpi eq, %arg1, %c0_i32_6 : i32
    %10 = arith.extui %9 : i1 to i32
    %c0_i32_7 = arith.constant 0 : i32
    %11 = arith.cmpi ne, %10, %c0_i32_7 : i32
    scf.if %11 {
      %c0_8 = arith.constant 0 : index
      %c0_9 = arith.constant 0 : index
      %12 = vector.load %arg4[%c0_8, %c0_9] : memref<8x8xf32, #tpu.memory_space<vmem>>, vector<8x8xf32>
      %cst_10 = arith.constant 4.8828125E-4 : f32
      %13 = vector.broadcast %cst_10 : f32 to vector<8x8xf32>
      %14 = arith.mulf %12, %13 : vector<8x8xf32>
      %c0_11 = arith.constant 0 : index
      %c0_12 = arith.constant 0 : index
      %c0_13 = arith.constant 0 : index
      %15 = vector.load %arg3[%c0_11, %c0_12, %c0_13] : memref<1x8x8xf32, #tpu.memory_space<vmem>>, vector<1x8x8xf32>
      %16 = vector.shape_cast %15 : vector<1x8x8xf32> to vector<8x8xf32>
      %17 = vector.shape_cast %14 : vector<8x8xf32> to vector<1x8x8xf32>
      tpu.vector_store %arg3[%c0_11, %c0_12, %c0_13], %17 {strides = array<i32>} : memref<1x8x8xf32, #tpu.memory_space<vmem>>, vector<1x8x8xf32>,
    } else {
    }
    return
  }
  func.func @transform_0(%arg0: i32, %arg1: i32) -> (i32, i32) {
    %c1_i32 = arith.constant 1 : i32
    %0 = arith.muli %arg0, %c1_i32 : i32
    %1 = arith.addi %0, %arg1 : i32
    %c0_i32 = arith.constant 0 : i32
    %c0_i32_0 = arith.constant 0 : i32
    return %c0_i32, %1 : i32, i32
  }
  func.func @transform_1(%arg0: i32, %arg1: i32) -> (i32, i32, i32) {
    %c0_i32 = arith.constant 0 : i32
    %c0_i32_0 = arith.constant 0 : i32
    %c0_i32_1 = arith.constant 0 : i32
    return %arg0, %c0_i32, %c0_i32_0 : i32, i32, i32
  }
}

</mosaic_0001>

<bundles_post_ra>
// kernel: gram_matrix.1
= control target key start
LH: loop header
LB: loop body
LE: loop exit
PB: predicated region body
PF: predicated region fallthrough
CT: control target
= control target key end

     0   :  { %vm36_vm0 = vcmask 64512   ;;  %s160_s0 = inlined_call_operand.vmem [shape: f32[8,256], index: 0, kind: input, shape index: {}]   ;;  %s161_s1 = inlined_call_operand.hbm [shape: f32[1,8,8], index: 1, kind: output, shape index: {}]  }
   0x1   :  { %v39_v0 = vld [vmem:[%s160_s0 + $0x8] sm:$0xff]  ;;  %v38_v1 = vld [vmem:[%s160_s0] sm:$0xff] }
   0x2   :  { %6 = vsyncpa [#allocation4], 0  ;;  %v41_v2 = vpack.c.bf16 %v39_v0, %v39_v0  ;;  %v40_v3 = vpack.c.bf16 %v38_v1, %v38_v1  ;;  %v136_v4 = vmov 0.0   ;;  %s137_s0 = smov [#allocation3]  }
   0x3   :  { %37 = vst.msk [vmem:[#allocation2] sm:$0xff] %vm36_vm0, %v136_v4  ;;  %s98_s10 = sshll.u32 %s137_s0, 4  ;;  %s99_s10 = int_to_ptr.vmem [resolvable:$true] %s98_s10 }
   0x4   :  { %57 = vmatprep.subr.bf16.mxu0 %v41_v2  ;;  %75 = vmatprep.mubr.bf16.mxu0 %v41_v2  ;;  %s114_s11 = scalar_lea.vmem %s99_s10, 128  ;;  %p119_p1 = scmp.lt.s32.totalorder %s99_s10, %s99_s10 }
   0x5   :  { %58 = vmatpush1.bf16.xpose.msra.mxu0 %v40_v3  ;;  %p115_p0 = scmp.ne.s32.totalorder %s99_s10, %s114_s11  ;;  %p120_p2 = scmp.lt.s32.totalorder %s114_s11, %s114_s11 }
   0x7   :  { %p121_p3 = por %p120_p2, %p119_p1 }
   0x9   :  { %p122_p4 = pnand %p121_p3, %p115_p0 }
   0xa   :  { %v42_v5 = vld [vmem:[#allocation2] sm:$0xff] }
   0xc   :  { %76 = vmatmul.mubr.bf16.vlgmr.msra.gmra.mxu0 %v40_v3 }
  0xcc   :  { %v77_v6 = vpop.f32.mrf.mxu0 }
  0xcd   :  { %v83_v7 = vadd.f32 %v77_v6, %v42_v5 }
  0xce   :  { %v79_v8 = vpop.f32.mrf.mxu0 }
  0xcf   :  { %85 = vst.msk [vmem:[#allocation2] sm:$0xff] %vm36_vm0, %v83_v7 }
  0xd0   :  { %v80_v9 = vpop.f32.mrf.mxu0 }
  0xd2   :  { %v81_v10 = vpop.f32.mrf.mxu0 }
  0xd6   :  { %v89_v11 = vld [vmem:[#allocation2] sm:$0xff] }
  0xd7   :  { %v90_v12 = vmul.f32 0.00048828125, %v89_v11 }
  0xd9   :  { %91 = vst.msk [vmem:[#allocation3] sm:$0xff] %vm36_vm0, %v90_v12 }
  0xda   :  { %125 = shalt.err (!%p122_p4)
}
  0xdb   :  { %101 = dma.vmem_to_hbm [thread:$0]  %s99_s10, 128, %s161_s1, [#allocation4]  }
  0xdc   :  { %134 = dma.done.wait [#allocation4], 128  }
  0xdd   :  { %135 = vsyncadd [#allocation4], 4294967168 }
  0xde   :  { %105 = vsyncpa [#allocation4], 1 }

</bundles_post_ra>
